<compile_context>
chip_gen: v7x
topology: tpu7x:2x2x1
jax: 0.10.0
libtpu: 0.0.40
codegen_flags: <defaults>
</compile_context>

<pallas_src>
import functools

import numpy as np
import jax
import jax.numpy as jnp
from jax.experimental import pallas as pl
from jax.experimental.pallas import tpu as pltpu

_LANES = 128       # lane width of a vreg
_SUBLANES = 8      # sublane count of a (f32) vreg
_TILE_T = 512      # time-axis block for large grids (>= 512 amortizes grid-step cost)
_NACC = 4          # independent accumulators to break the serial add chain


def _interp_kernel(x_ref, y_ref, t_ref, o_ref):
    """np.interp(t, x[c], y[c], left=0, right=0) for all channels of one time tile."""
    x = x_ref[...]                                   # (C, L) retention times (increasing)
    y = y_ref[...]                                   # (C, L) intensities
    C, L = x.shape
    tile_t = o_ref.shape[1]

    # --- hoisted broadcasts (done exactly once; JAX does not CSE broadcast_in_dim) ---
    t_b = jnp.broadcast_to(t_ref[...], (C, tile_t))  # (C, Tt) sublane broadcast of grid
    x0c = x[:, 0:1]                                  # per-channel time origin
    t_c = t_b - x0c                                  # recentered queries (lane bcast x1)

    accs = [jnp.zeros((C, tile_t), jnp.float32) for _ in range(_NACC)]

    if L >= 2:
        xc = x - x0c                                 # recentered knots
        dx = xc[:, 1:] - xc[:, :-1]
        # guard duplicated knots: zero-length segments contribute nothing (w == 0),
        # the guard only avoids NaN/Inf that would poison the multiplicative mask.
        slope = (y[:, 1:] - y[:, :-1]) / jnp.where(dx == 0.0, 1.0, dx)   # (C, L-1)
        # intercepts in recentered coords: seg_s(t) = c_s + slope_s * t_c  (no
        # cancellation because |xc|, |t_c| stay small after recentering).
        c = y[:, :-1] - slope * xc[:, :-1]                               # (C, L-1)

        # Statically unrolled over the (small) number of raw XIC segments. Rolling
        # ge_cur/ge_next means each knot comparison (and its lane broadcast) happens
        # exactly once, and the live vreg set is O(1) in L (no spills for larger L).
        # TODO(synk): for very long XICs (hundreds of knots) switch this unroll to a
        # lax.fori_loop(..., unroll=4) to cap program size / compile time.
        ge_cur = (t_b >= x[:, 0:1]).astype(jnp.float32)
        for s in range(L - 1):
            ge_next = (t_b >= x[:, s + 1:s + 2]).astype(jnp.float32)
            w = ge_cur - ge_next                     # 1.0 inside [x_s, x_{s+1}), else 0
            seg = c[:, s:s + 1] + slope[:, s:s + 1] * t_c
            accs[s % _NACC] = accs[s % _NACC] + w * seg
            ge_cur = ge_next

    acc = (accs[0] + accs[1]) + (accs[2] + accs[3])
    # np.interp: a query exactly at the right edge returns y[:, -1] (not the fill value)
    acc = jnp.where(t_b == x[:, L - 1:L], y[:, L - 1:L], acc)
    o_ref[...] = acc


@functools.partial(jax.jit, static_argnames=("num_trans", "valid_t", "tile_t"))
def _resample_reshape(x_all, y_all, t_padded, *, num_trans, valid_t, tile_t):
    """One executable: pallas interpolation + un-pad slice + (2, n, T) reshape."""
    C, L = x_all.shape
    Tp = t_padded.shape[1]
    heat = pl.pallas_call(
        _interp_kernel,
        out_shape=jax.ShapeDtypeStruct((C, Tp), jnp.float32),
        grid=(Tp // tile_t,),
        in_specs=[
            pl.BlockSpec((C, L), lambda i: (0, 0)),        # knot times stay resident
            pl.BlockSpec((C, L), lambda i: (0, 0)),        # knot intensities
            pl.BlockSpec((1, tile_t), lambda i: (0, i)),   # query-time tile
        ],
        out_specs=pl.BlockSpec((C, tile_t), lambda i: (0, i)),
        compiler_params=pltpu.CompilerParams(dimension_semantics=("parallel",)),
    )(x_all, y_all, t_padded)
    # Slice off channel/time padding and reshape to match np.zeros((2, n, T)).
    return heat[: 2 * num_trans, :valid_t].reshape(2, num_trans, valid_t)


def make_input(light_xics, heavy_xics, *, cycle_time=0.5):
    """Port of MakeInput.forward (force_resampling path, no reference RT).

    light_xics / heavy_xics: float32 arrays of shape (num_trans, 2, L) where
    [:, 0, :] are retention times and [:, 1, :] intensities.
    Returns (xic_heatmap (2, num_trans, T) float32, time_points (T,) float32).
    """
    # TODO(synk): ragged per-transition XIC lengths, the `equal_xic_len` fast path and
    # the use_rt / ref_rt_key branch of _get_sample_points are data-dependent host-side
    # control flow on a python dict; only the resampling hot loop runs in the kernel.
    light = np.asarray(light_xics, np.float32)
    heavy = np.asarray(heavy_xics, np.float32)
    num_trans = light.shape[0]
    if heavy.shape[0] != num_trans:
        raise ValueError("The pairs of heavy and light XICs do not match.")

    x_all = np.concatenate([light[:, 0, :], heavy[:, 0, :]], axis=0)   # (C_real, L)
    y_all = np.concatenate([light[:, 1, :], heavy[:, 1, :]], axis=0)   # (C_real, L)
    L = x_all.shape[1]

    # _get_sample_points (use_rt=False path) -- data-dependent grid size, host glue.
    min_rt = x_all[:, 0].max()
    max_rt = x_all[:, -1].min()
    if max_rt < min_rt:
        min_rt = x_all[:, 0].min()
        max_rt = x_all[:, -1].max()
    n_points = int((max_rt - min_rt) / cycle_time)
    time_points = np.linspace(min_rt, max_rt, n_points, dtype=np.float32)
    T = time_points.shape[0]

    # Bucket/pad the query grid to a lane-dense, tile-aligned width so the kernel shape
    # is static across calls (no recompiles within a bucket) and every output store is
    # full-lane unmasked; padded lanes use a sentinel past every knot -> interp == 0.
    sentinel = np.float32(x_all.max() + 1.0)
    Tp = max(_LANES, -(-T // _LANES) * _LANES)
    if Tp > _TILE_T:
        tile_t = _TILE_T
        Tp = -(-Tp // _TILE_T) * _TILE_T
    else:
        tile_t = Tp
    t_padded = np.full((1, Tp), sentinel, dtype=np.float32)
    t_padded[0, :T] = time_points

    # Pad channel count to a multiple of 8 sublanes (full-sublane vregs / unmasked vst);
    # padded channels replicate a valid, increasing time axis with zero intensity.
    C_real = 2 * num_trans
    C = max(_SUBLANES, -(-C_real // _SUBLANES) * _SUBLANES)
    if C > C_real:
        x_all = np.concatenate(
            [x_all, np.repeat(x_all[-1:], C - C_real, axis=0)], axis=0)
        y_all = np.concatenate(
            [y_all, np.zeros((C - C_real, L), np.float32)], axis=0)

    # TODO(synk): for production, keep x/y resident on device across calls; the
    # data-dependent time-grid length forces this host round-trip here.
    xic_heatmap = _resample_reshape(
        jnp.asarray(x_all), jnp.asarray(y_all), jnp.asarray(t_padded),
        num_trans=num_trans, valid_t=T, tile_t=tile_t,
    )
    return xic_heatmap, time_points


if __name__ == "__main__":
    key = jax.random.PRNGKey(0)

    def build_case(k, num_trans, L, xic_step):
        k1, k2, k3 = jax.random.split(k, 3)
        C = 2 * num_trans
        # deterministic synthetic XICs: misaligned time axes force the resampling path
        starts = np.asarray(
            jax.random.uniform(k1, (C,), minval=0.0, maxval=2.0), np.float32)
        amps = np.asarray(
            jax.random.uniform(k2, (C,), minval=1.0, maxval=10.0), np.float32)
        centers = np.asarray(
            jax.random.uniform(k3, (C,), minval=4.0, maxval=8.0), np.float32)
        grid = np.arange(L, dtype=np.float32) * xic_step
        x_all = (starts[:, None] + grid[None, :]).astype(np.float32)          # (C, L)
        y_all = (amps[:, None] *
                 np.exp(-0.5 * ((x_all - centers[:, None]) / 1.2) ** 2)).astype(np.float32)
        light = np.stack([x_all[:num_trans], y_all[:num_trans]], axis=1)      # (n,2,L)
        heavy = np.stack([x_all[num_trans:], y_all[num_trans:]], axis=1)
        return light, heavy, x_all, y_all

    cases = [
        dict(num_trans=4, L=24, xic_step=0.5, cycle_time=0.5),    # small grid, 1 tile
        dict(num_trans=5, L=40, xic_step=0.25, cycle_time=0.01),  # C padding + Tp tiling
    ]
    for cfg, k in zip(cases, jax.random.split(key, len(cases))):
        light, heavy, x_all, y_all = build_case(
            k, cfg["num_trans"], cfg["L"], cfg["xic_step"])
        heatmap, time_points = make_input(light, heavy, cycle_time=cfg["cycle_time"])
        heatmap = jax.block_until_ready(heatmap)

        # reference: the numpy path of MakeInput.forward
        ref = np.zeros((2, cfg["num_trans"], len(time_points)), dtype=np.float32)
        for j in range(2):
            for i in range(cfg["num_trans"]):
                xs = x_all[j * cfg["num_trans"] + i]
                ys = y_all[j * cfg["num_trans"] + i]
                ref[j, i, :] = np.interp(time_points, xs, ys, left=0, right=0)

        assert heatmap.shape == ref.shape
        assert heatmap.dtype == jnp.float32
        np.testing.assert_allclose(np.asarray(heatmap), ref, rtol=1e-4, atol=1e-3)

    print("KERNEL_OK")
</pallas_src>

<mosaic_0001>
module attributes {stable_mosaic.version = 11 : i64} {
  func.func @_interp_kernel(%arg0: i32, %arg1: memref<8x24xf32, #tpu.memory_space<vmem>>, %arg2: memref<8x24xf32, #tpu.memory_space<vmem>>, %arg3: memref<1x128xf32, #tpu.memory_space<vmem>>, %arg4: memref<8x128xf32, #tpu.memory_space<vmem>>) attributes {dimension_semantics = [#tpu.dimension_semantics<parallel>], iteration_bounds = array<i64: 1>, scalar_prefetch = 0 : i64, scratch_operands = 0 : i64, tpu.core_type = #tpu.core_type<tc>, window_params = [{pipeline_mode = #tpu.pipeline_mode<synchronous>, transform_indices = @transform_0, window_bounds = array<i64: 8, 24>}, {pipeline_mode = #tpu.pipeline_mode<synchronous>, transform_indices = @transform_1, window_bounds = array<i64: 8, 24>}, {transform_indices = @transform_2, window_bounds = array<i64: 1, 128>}, {transform_indices = @transform_3, window_bounds = array<i64: 8, 128>}]} {
    %c0 = arith.constant 0 : index
    %c0_0 = arith.constant 0 : index
    %0 = vector.load %arg1[%c0, %c0_0] : memref<8x24xf32, #tpu.memory_space<vmem>>, vector<8x24xf32>
    %c0_1 = arith.constant 0 : index
    %c0_2 = arith.constant 0 : index
    %1 = vector.load %arg2[%c0_1, %c0_2] : memref<8x24xf32, #tpu.memory_space<vmem>>, vector<8x24xf32>
    %c0_3 = arith.constant 0 : index
    %c0_4 = arith.constant 0 : index
    %2 = vector.load %arg3[%c0_3, %c0_4] : memref<1x128xf32, #tpu.memory_space<vmem>>, vector<1x128xf32>
    %3 = vector.shape_cast %2 : vector<1x128xf32> to vector<1x128xf32>
    %4 = vector.broadcast %3 : vector<1x128xf32> to vector<8x128xf32>
    %5 = vector.extract_strided_slice %0 {offsets = [0, 0], sizes = [8, 1], strides = [1, 1]} : vector<8x24xf32> to vector<8x1xf32>
    %6 = vector.broadcast %5 : vector<8x1xf32> to vector<8x128xf32>
    %7 = arith.subf %4, %6 : vector<8x128xf32>
    %cst = arith.constant 0.000000e+00 : f32
    %8 = vector.broadcast %cst : f32 to vector<8x128xf32>
    %cst_5 = arith.constant 0.000000e+00 : f32
    %9 = vector.broadcast %cst_5 : f32 to vector<8x128xf32>
    %cst_6 = arith.constant 0.000000e+00 : f32
    %10 = vector.broadcast %cst_6 : f32 to vector<8x128xf32>
    %cst_7 = arith.constant 0.000000e+00 : f32
    %11 = vector.broadcast %cst_7 : f32 to vector<8x128xf32>
    %12 = vector.broadcast %5 : vector<8x1xf32> to vector<8x24xf32>
    %13 = arith.subf %0, %12 : vector<8x24xf32>
    %14 = vector.extract_strided_slice %13 {offsets = [0, 1], sizes = [8, 23], strides = [1, 1]} : vector<8x24xf32> to vector<8x23xf32>
    %15 = vector.extract_strided_slice %13 {offsets = [0, 0], sizes = [8, 23], strides = [1, 1]} : vector<8x24xf32> to vector<8x23xf32>
    %16 = arith.subf %14, %15 : vector<8x23xf32>
    %17 = vector.extract_strided_slice %1 {offsets = [0, 1], sizes = [8, 23], strides = [1, 1]} : vector<8x24xf32> to vector<8x23xf32>
    %18 = vector.extract_strided_slice %1 {offsets = [0, 0], sizes = [8, 23], strides = [1, 1]} : vector<8x24xf32> to vector<8x23xf32>
    %19 = arith.subf %17, %18 : vector<8x23xf32>
    %cst_8 = arith.constant 0.000000e+00 : f32
    %20 = vector.broadcast %cst_8 : f32 to vector<8x23xf32>
    %21 = arith.cmpf oeq, %16, %20 : vector<8x23xf32>
    %cst_9 = arith.constant 1.000000e+00 : f32
    %22 = vector.broadcast %cst_9 : f32 to vector<8x23xf32>
    %23 = arith.select %21, %22, %16 : vector<8x23xi1>, vector<8x23xf32>
    %24 = arith.divf %19, %23 : vector<8x23xf32>
    %25 = vector.extract_strided_slice %1 {offsets = [0, 0], sizes = [8, 23], strides = [1, 1]} : vector<8x24xf32> to vector<8x23xf32>
    %26 = vector.extract_strided_slice %13 {offsets = [0, 0], sizes = [8, 23], strides = [1, 1]} : vector<8x24xf32> to vector<8x23xf32>
    %27 = arith.mulf %24, %26 : vector<8x23xf32>
    %28 = arith.subf %25, %27 : vector<8x23xf32>
    %29 = vector.extract_strided_slice %0 {offsets = [0, 0], sizes = [8, 1], strides = [1, 1]} : vector<8x24xf32> to vector<8x1xf32>
    %30 = vector.broadcast %29 : vector<8x1xf32> to vector<8x128xf32>
    %31 = arith.cmpf oge, %4, %30 : vector<8x128xf32>
    %32 = arith.extui %31 : vector<8x128xi1> to vector<8x128xi32>
    %33 = arith.sitofp %32 : vector<8x128xi32> to vector<8x128xf32>
    %34 = vector.extract_strided_slice %0 {offsets = [0, 1], sizes = [8, 1], strides = [1, 1]} : vector<8x24xf32> to vector<8x1xf32>
    %35 = vector.broadcast %34 : vector<8x1xf32> to vector<8x128xf32>
    %36 = arith.cmpf oge, %4, %35 : vector<8x128xf32>
    %37 = arith.extui %36 : vector<8x128xi1> to vector<8x128xi32>
    %38 = arith.sitofp %37 : vector<8x128xi32> to vector<8x128xf32>
    %39 = arith.subf %33, %38 : vector<8x128xf32>
    %40 = vector.extract_strided_slice %28 {offsets = [0, 0], sizes = [8, 1], strides = [1, 1]} : vector<8x23xf32> to vector<8x1xf32>
    %41 = vector.extract_strided_slice %24 {offsets = [0, 0], sizes = [8, 1], strides = [1, 1]} : vector<8x23xf32> to vector<8x1xf32>
    %42 = vector.broadcast %41 : vector<8x1xf32> to vector<8x128xf32>
    %43 = arith.mulf %42, %7 : vector<8x128xf32>
    %44 = vector.broadcast %40 : vector<8x1xf32> to vector<8x128xf32>
    %45 = arith.addf %44, %43 : vector<8x128xf32>
    %46 = arith.mulf %39, %45 : vector<8x128xf32>
    %47 = arith.addf %8, %46 : vector<8x128xf32>
    %48 = vector.extract_strided_slice %0 {offsets = [0, 2], sizes = [8, 1], strides = [1, 1]} : vector<8x24xf32> to vector<8x1xf32>
    %49 = vector.broadcast %48 : vector<8x1xf32> to vector<8x128xf32>
    %50 = arith.cmpf oge, %4, %49 : vector<8x128xf32>
    %51 = arith.extui %50 : vector<8x128xi1> to vector<8x128xi32>
    %52 = arith.sitofp %51 : vector<8x128xi32> to vector<8x128xf32>
    %53 = arith.subf %38, %52 : vector<8x128xf32>
    %54 = vector.extract_strided_slice %28 {offsets = [0, 1], sizes = [8, 1], strides = [1, 1]} : vector<8x23xf32> to vector<8x1xf32>
    %55 = vector.extract_strided_slice %24 {offsets = [0, 1], sizes = [8, 1], strides = [1, 1]} : vector<8x23xf32> to vector<8x1xf32>
    %56 = vector.broadcast %55 : vector<8x1xf32> to vector<8x128xf32>
    %57 = arith.mulf %56, %7 : vector<8x128xf32>
    %58 = vector.broadcast %54 : vector<8x1xf32> to vector<8x128xf32>
    %59 = arith.addf %58, %57 : vector<8x128xf32>
    %60 = arith.mulf %53, %59 : vector<8x128xf32>
    %61 = arith.addf %9, %60 : vector<8x128xf32>
    %62 = vector.extract_strided_slice %0 {offsets = [0, 3], sizes = [8, 1], strides = [1, 1]} : vector<8x24xf32> to vector<8x1xf32>
    %63 = vector.broadcast %62 : vector<8x1xf32> to vector<8x128xf32>
    %64 = arith.cmpf oge, %4, %63 : vector<8x128xf32>
    %65 = arith.extui %64 : vector<8x128xi1> to vector<8x128xi32>
    %66 = arith.sitofp %65 : vector<8x128xi32> to vector<8x128xf32>
    %67 = arith.subf %52, %66 : vector<8x128xf32>
    %68 = vector.extract_strided_slice %28 {offsets = [0, 2], sizes = [8, 1], strides = [1, 1]} : vector<8x23xf32> to vector<8x1xf32>
    %69 = vector.extract_strided_slice %24 {offsets = [0, 2], sizes = [8, 1], strides = [1, 1]} : vector<8x23xf32> to vector<8x1xf32>
    %70 = vector.broadcast %69 : vector<8x1xf32> to vector<8x128xf32>
    %71 = arith.mulf %70, %7 : vector<8x128xf32>
    %72 = vector.broadcast %68 : vector<8x1xf32> to vector<8x128xf32>
    %73 = arith.addf %72, %71 : vector<8x128xf32>
    %74 = arith.mulf %67, %73 : vector<8x128xf32>
    %75 = arith.addf %10, %74 : vector<8x128xf32>
    %76 = vector.extract_strided_slice %0 {offsets = [0, 4], sizes = [8, 1], strides = [1, 1]} : vector<8x24xf32> to vector<8x1xf32>
    %77 = vector.broadcast %76 : vector<8x1xf32> to vector<8x128xf32>
    %78 = arith.cmpf oge, %4, %77 : vector<8x128xf32>
    %79 = arith.extui %78 : vector<8x128xi1> to vector<8x128xi32>
    %80 = arith.sitofp %79 : vector<8x128xi32> to vector<8x128xf32>
    %81 = arith.subf %66, %80 : vector<8x128xf32>
    %82 = vector.extract_strided_slice %28 {offsets = [0, 3], sizes = [8, 1], strides = [1, 1]} : vector<8x23xf32> to vector<8x1xf32>
    %83 = vector.extract_strided_slice %24 {offsets = [0, 3], sizes = [8, 1], strides = [1, 1]} : vector<8x23xf32> to vector<8x1xf32>
    %84 = vector.broadcast %83 : vector<8x1xf32> to vector<8x128xf32>
    %85 = arith.mulf %84, %7 : vector<8x128xf32>
    %86 = vector.broadcast %82 : vector<8x1xf32> to vector<8x128xf32>
    %87 = arith.addf %86, %85 : vector<8x128xf32>
    %88 = arith.mulf %81, %87 : vector<8x128xf32>
    %89 = arith.addf %11, %88 : vector<8x128xf32>
    %90 = vector.extract_strided_slice %0 {offsets = [0, 5], sizes = [8, 1], strides = [1, 1]} : vector<8x24xf32> to vector<8x1xf32>
    %91 = vector.broadcast %90 : vector<8x1xf32> to vector<8x128xf32>
    %92 = arith.cmpf oge, %4, %91 : vector<8x128xf32>
    %93 = arith.extui %92 : vector<8x128xi1> to vector<8x128xi32>
    %94 = arith.sitofp %93 : vector<8x128xi32> to vector<8x128xf32>
    %95 = arith.subf %80, %94 : vector<8x128xf32>
    %96 = vector.extract_strided_slice %28 {offsets = [0, 4], sizes = [8, 1], strides = [1, 1]} : vector<8x23xf32> to vector<8x1xf32>
    %97 = vector.extract_strided_slice %24 {offsets = [0, 4], sizes = [8, 1], strides = [1, 1]} : vector<8x23xf32> to vector<8x1xf32>
    %98 = vector.broadcast %97 : vector<8x1xf32> to vector<8x128xf32>
    %99 = arith.mulf %98, %7 : vector<8x128xf32>
    %100 = vector.broadcast %96 : vector<8x1xf32> to vector<8x128xf32>
    %101 = arith.addf %100, %99 : vector<8x128xf32>
    %102 = arith.mulf %95, %101 : vector<8x128xf32>
    %103 = arith.addf %47, %102 : vector<8x128xf32>
    %104 = vector.extract_strided_slice %0 {offsets = [0, 6], sizes = [8, 1], strides = [1, 1]} : vector<8x24xf32> to vector<8x1xf32>
    %105 = vector.broadcast %104 : vector<8x1xf32> to vector<8x128xf32>
    %106 = arith.cmpf oge, %4, %105 : vector<8x128xf32>
    %107 = arith.extui %106 : vector<8x128xi1> to vector<8x128xi32>
    %108 = arith.sitofp %107 : vector<8x128xi32> to vector<8x128xf32>
    %109 = arith.subf %94, %108 : vector<8x128xf32>
    %110 = vector.extract_strided_slice %28 {offsets = [0, 5], sizes = [8, 1], strides = [1, 1]} : vector<8x23xf32> to vector<8x1xf32>
    %111 = vector.extract_strided_slice %24 {offsets = [0, 5], sizes = [8, 1], strides = [1, 1]} : vector<8x23xf32> to vector<8x1xf32>
    %112 = vector.broadcast %111 : vector<8x1xf32> to vector<8x128xf32>
    %113 = arith.mulf %112, %7 : vector<8x128xf32>
    %114 = vector.broadcast %110 : vector<8x1xf32> to vector<8x128xf32>
    %115 = arith.addf %114, %113 : vector<8x128xf32>
    %116 = arith.mulf %109, %115 : vector<8x128xf32>
    %117 = arith.addf %61, %116 : vector<8x128xf32>
    %118 = vector.extract_strided_slice %0 {offsets = [0, 7], sizes = [8, 1], strides = [1, 1]} : vector<8x24xf32> to vector<8x1xf32>
    %119 = vector.broadcast %118 : vector<8x1xf32> to vector<8x128xf32>
    %120 = arith.cmpf oge, %4, %119 : vector<8x128xf32>
    %121 = arith.extui %120 : vector<8x128xi1> to vector<8x128xi32>
    %122 = arith.sitofp %121 : vector<8x128xi32> to vector<8x128xf32>
    %123 = arith.subf %108, %122 : vector<8x128xf32>
    %124 = vector.extract_strided_slice %28 {offsets = [0, 6], sizes = [8, 1], strides = [1, 1]} : vector<8x23xf32> to vector<8x1xf32>
    %125 = vector.extract_strided_slice %24 {offsets = [0, 6], sizes = [8, 1], strides = [1, 1]} : vector<8x23xf32> to vector<8x1xf32>
    %126 = vector.broadcast %125 : vector<8x1xf32> to vector<8x128xf32>
    %127 = arith.mulf %126, %7 : vector<8x128xf32>
    %128 = vector.broadcast %124 : vector<8x1xf32> to vector<8x128xf32>
    %129 = arith.addf %128, %127 : vector<8x128xf32>
    %130 = arith.mulf %123, %129 : vector<8x128xf32>
    %131 = arith.addf %75, %130 : vector<8x128xf32>
    %132 = vector.extract_strided_slice %0 {offsets = [0, 8], sizes = [8, 1], strides = [1, 1]} : vector<8x24xf32> to vector<8x1xf32>
    %133 = vector.broadcast %132 : vector<8x1xf32> to vector<8x128xf32>
    %134 = arith.cmpf oge, %4, %133 : vector<8x128xf32>
    %135 = arith.extui %134 : vector<8x128xi1> to vector<8x128xi32>
    %136 = arith.sitofp %135 : vector<8x128xi32> to vector<8x128xf32>
    %137 = arith.subf %122, %136 : vector<8x128xf32>
    %138 = vector.extract_strided_slice %28 {offsets = [0, 7], sizes = [8, 1], strides = [1, 1]} : vector<8x23xf32> to vector<8x1xf32>
    %139 = vector.extract_strided_slice %24 {offsets = [0, 7], sizes = [8, 1], strides = [1, 1]} : vector<8x23xf32> to vector<8x1xf32>
    %140 = vector.broadcast %139 : vector<8x1xf32> to vector<8x128xf32>
    %141 = arith.mulf %140, %7 : vector<8x128xf32>
    %142 = vector.broadcast %138 : vector<8x1xf32> to vector<8x128xf32>
    %143 = arith.addf %142, %141 : vector<8x128xf32>
    %144 = arith.mulf %137, %143 : vector<8x128xf32>
    %145 = arith.addf %89, %144 : vector<8x128xf32>
    %146 = vector.extract_strided_slice %0 {offsets = [0, 9], sizes = [8, 1], strides = [1, 1]} : vector<8x24xf32> to vector<8x1xf32>
    %147 = vector.broadcast %146 : vector<8x1xf32> to vector<8x128xf32>
    %148 = arith.cmpf oge, %4, %147 : vector<8x128xf32>
    %149 = arith.extui %148 : vector<8x128xi1> to vector<8x128xi32>
    %150 = arith.sitofp %149 : vector<8x128xi32> to vector<8x128xf32>
    %151 = arith.subf %136, %150 : vector<8x128xf32>
    %152 = vector.extract_strided_slice %28 {offsets = [0, 8], sizes = [8, 1], strides = [1, 1]} : vector<8x23xf32> to vector<8x1xf32>
    %153 = vector.extract_strided_slice %24 {offsets = [0, 8], sizes = [8, 1], strides = [1, 1]} : vector<8x23xf32> to vector<8x1xf32>
    %154 = vector.broadcast %153 : vector<8x1xf32> to vector<8x128xf32>
    %155 = arith.mulf %154, %7 : vector<8x128xf32>
    %156 = vector.broadcast %152 : vector<8x1xf32> to vector<8x128xf32>
    %157 = arith.addf %156, %155 : vector<8x128xf32>
    %158 = arith.mulf %151, %157 : vector<8x128xf32>
    %159 = arith.addf %103, %158 : vector<8x128xf32>
    %160 = vector.extract_strided_slice %0 {offsets = [0, 10], sizes = [8, 1], strides = [1, 1]} : vector<8x24xf32> to vector<8x1xf32>
    %161 = vector.broadcast %160 : vector<8x1xf32> to vector<8x128xf32>
    %162 = arith.cmpf oge, %4, %161 : vector<8x128xf32>
    %163 = arith.extui %162 : vector<8x128xi1> to vector<8x128xi32>
    %164 = arith.sitofp %163 : vector<8x128xi32> to vector<8x128xf32>
    %165 = arith.subf %150, %164 : vector<8x128xf32>
    %166 = vector.extract_strided_slice %28 {offsets = [0, 9], sizes = [8, 1], strides = [1, 1]} : vector<8x23xf32> to vector<8x1xf32>
    %167 = vector.extract_strided_slice %24 {offsets = [0, 9], sizes = [8, 1], strides = [1, 1]} : vector<8x23xf32> to vector<8x1xf32>
    %168 = vector.broadcast %167 : vector<8x1xf32> to vector<8x128xf32>
    %169 = arith.mulf %168, %7 : vector<8x128xf32>
    %170 = vector.broadcast %166 : vector<8x1xf32> to vector<8x128xf32>
    %171 = arith.addf %170, %169 : vector<8x128xf32>
    %172 = arith.mulf %165, %171 : vector<8x128xf32>
    %173 = arith.addf %117, %172 : vector<8x128xf32>
    %174 = vector.extract_strided_slice %0 {offsets = [0, 11], sizes = [8, 1], strides = [1, 1]} : vector<8x24xf32> to vector<8x1xf32>
    %175 = vector.broadcast %174 : vector<8x1xf32> to vector<8x128xf32>
    %176 = arith.cmpf oge, %4, %175 : vector<8x128xf32>
    %177 = arith.extui %176 : vector<8x128xi1> to vector<8x128xi32>
    %178 = arith.sitofp %177 : vector<8x128xi32> to vector<8x128xf32>
    %179 = arith.subf %164, %178 : vector<8x128xf32>
    %180 = vector.extract_strided_slice %28 {offsets = [0, 10], sizes = [8, 1], strides = [1, 1]} : vector<8x23xf32> to vector<8x1xf32>
    %181 = vector.extract_strided_slice %24 {offsets = [0, 10], sizes = [8, 1], strides = [1, 1]} : vector<8x23xf32> to vector<8x1xf32>
    %182 = vector.broadcast %181 : vector<8x1xf32> to vector<8x128xf32>
    %183 = arith.mulf %182, %7 : vector<8x128xf32>
    %184 = vector.broadcast %180 : vector<8x1xf32> to vector<8x128xf32>
    %185 = arith.addf %184, %183 : vector<8x128xf32>
    %186 = arith.mulf %179, %185 : vector<8x128xf32>
    %187 = arith.addf %131, %186 : vector<8x128xf32>
    %188 = vector.extract_strided_slice %0 {offsets = [0, 12], sizes = [8, 1], strides = [1, 1]} : vector<8x24xf32> to vector<8x1xf32>
    %189 = vector.broadcast %188 : vector<8x1xf32> to vector<8x128xf32>
    %190 = arith.cmpf oge, %4, %189 : vector<8x128xf32>
    %191 = arith.extui %190 : vector<8x128xi1> to vector<8x128xi32>
    %192 = arith.sitofp %191 : vector<8x128xi32> to vector<8x128xf32>
    %193 = arith.subf %178, %192 : vector<8x128xf32>
    %194 = vector.extract_strided_slice %28 {offsets = [0, 11], sizes = [8, 1], strides = [1, 1]} : vector<8x23xf32> to vector<8x1xf32>
    %195 = vector.extract_strided_slice %24 {offsets = [0, 11], sizes = [8, 1], strides = [1, 1]} : vector<8x23xf32> to vector<8x1xf32>
    %196 = vector.broadcast %195 : vector<8x1xf32> to vector<8x128xf32>
    %197 = arith.mulf %196, %7 : vector<8x128xf32>
    %198 = vector.broadcast %194 : vector<8x1xf32> to vector<8x128xf32>
    %199 = arith.addf %198, %197 : vector<8x128xf32>
    %200 = arith.mulf %193, %199 : vector<8x128xf32>
    %201 = arith.addf %145, %200 : vector<8x128xf32>
    %202 = vector.extract_strided_slice %0 {offsets = [0, 13], sizes = [8, 1], strides = [1, 1]} : vector<8x24xf32> to vector<8x1xf32>
    %203 = vector.broadcast %202 : vector<8x1xf32> to vector<8x128xf32>
    %204 = arith.cmpf oge, %4, %203 : vector<8x128xf32>
    %205 = arith.extui %204 : vector<8x128xi1> to vector<8x128xi32>
    %206 = arith.sitofp %205 : vector<8x128xi32> to vector<8x128xf32>
    %207 = arith.subf %192, %206 : vector<8x128xf32>
    %208 = vector.extract_strided_slice %28 {offsets = [0, 12], sizes = [8, 1], strides = [1, 1]} : vector<8x23xf32> to vector<8x1xf32>
    %209 = vector.extract_strided_slice %24 {offsets = [0, 12], sizes = [8, 1], strides = [1, 1]} : vector<8x23xf32> to vector<8x1xf32>
    %210 = vector.broadcast %209 : vector<8x1xf32> to vector<8x128xf32>
    %211 = arith.mulf %210, %7 : vector<8x128xf32>
    %212 = vector.broadcast %208 : vector<8x1xf32> to vector<8x128xf32>
    %213 = arith.addf %212, %211 : vector<8x128xf32>
    %214 = arith.mulf %207, %213 : vector<8x128xf32>
    %215 = arith.addf %159, %214 : vector<8x128xf32>
    %216 = vector.extract_strided_slice %0 {offsets = [0, 14], sizes = [8, 1], strides = [1, 1]} : vector<8x24xf32> to vector<8x1xf32>
    %217 = vector.broadcast %216 : vector<8x1xf32> to vector<8x128xf32>
    %218 = arith.cmpf oge, %4, %217 : vector<8x128xf32>
    %219 = arith.extui %218 : vector<8x128xi1> to vector<8x128xi32>
    %220 = arith.sitofp %219 : vector<8x128xi32> to vector<8x128xf32>
    %221 = arith.subf %206, %220 : vector<8x128xf32>
    %222 = vector.extract_strided_slice %28 {offsets = [0, 13], sizes = [8, 1], strides = [1, 1]} : vector<8x23xf32> to vector<8x1xf32>
    %223 = vector.extract_strided_slice %24 {offsets = [0, 13], sizes = [8, 1], strides = [1, 1]} : vector<8x23xf32> to vector<8x1xf32>
    %224 = vector.broadcast %223 : vector<8x1xf32> to vector<8x128xf32>
    %225 = arith.mulf %224, %7 : vector<8x128xf32>
    %226 = vector.broadcast %222 : vector<8x1xf32> to vector<8x128xf32>
    %227 = arith.addf %226, %225 : vector<8x128xf32>
    %228 = arith.mulf %221, %227 : vector<8x128xf32>
    %229 = arith.addf %173, %228 : vector<8x128xf32>
    %230 = vector.extract_strided_slice %0 {offsets = [0, 15], sizes = [8, 1], strides = [1, 1]} : vector<8x24xf32> to vector<8x1xf32>
    %231 = vector.broadcast %230 : vector<8x1xf32> to vector<8x128xf32>
    %232 = arith.cmpf oge, %4, %231 : vector<8x128xf32>
    %233 = arith.extui %232 : vector<8x128xi1> to vector<8x128xi32>
    %234 = arith.sitofp %233 : vector<8x128xi32> to vector<8x128xf32>
    %235 = arith.subf %220, %234 : vector<8x128xf32>
    %236 = vector.extract_strided_slice %28 {offsets = [0, 14], sizes = [8, 1], strides = [1, 1]} : vector<8x23xf32> to vector<8x1xf32>
    %237 = vector.extract_strided_slice %24 {offsets = [0, 14], sizes = [8, 1], strides = [1, 1]} : vector<8x23xf32> to vector<8x1xf32>
    %238 = vector.broadcast %237 : vector<8x1xf32> to vector<8x128xf32>
    %239 = arith.mulf %238, %7 : vector<8x128xf32>
    %240 = vector.broadcast %236 : vector<8x1xf32> to vector<8x128xf32>
    %241 = arith.addf %240, %239 : vector<8x128xf32>
    %242 = arith.mulf %235, %241 : vector<8x128xf32>
    %243 = arith.addf %187, %242 : vector<8x128xf32>
    %244 = vector.extract_strided_slice %0 {offsets = [0, 16], sizes = [8, 1], strides = [1, 1]} : vector<8x24xf32> to vector<8x1xf32>
    %245 = vector.broadcast %244 : vector<8x1xf32> to vector<8x128xf32>
    %246 = arith.cmpf oge, %4, %245 : vector<8x128xf32>
    %247 = arith.extui %246 : vector<8x128xi1> to vector<8x128xi32>
    %248 = arith.sitofp %247 : vector<8x128xi32> to vector<8x128xf32>
    %249 = arith.subf %234, %248 : vector<8x128xf32>
    %250 = vector.extract_strided_slice %28 {offsets = [0, 15], sizes = [8, 1], strides = [1, 1]} : vector<8x23xf32> to vector<8x1xf32>
    %251 = vector.extract_strided_slice %24 {offsets = [0, 15], sizes = [8, 1], strides = [1, 1]} : vector<8x23xf32> to vector<8x1xf32>
    %252 = vector.broadcast %251 : vector<8x1xf32> to vector<8x128xf32>
    %253 = arith.mulf %252, %7 : vector<8x128xf32>
    %254 = vector.broadcast %250 : vector<8x1xf32> to vector<8x128xf32>
    %255 = arith.addf %254, %253 : vector<8x128xf32>
    %256 = arith.mulf %249, %255 : vector<8x128xf32>
    %257 = arith.addf %201, %256 : vector<8x128xf32>
    %258 = vector.extract_strided_slice %0 {offsets = [0, 17], sizes = [8, 1], strides = [1, 1]} : vector<8x24xf32> to vector<8x1xf32>
    %259 = vector.broadcast %258 : vector<8x1xf32> to vector<8x128xf32>
    %260 = arith.cmpf oge, %4, %259 : vector<8x128xf32>
    %261 = arith.extui %260 : vector<8x128xi1> to vector<8x128xi32>
    %262 = arith.sitofp %261 : vector<8x128xi32> to vector<8x128xf32>
    %263 = arith.subf %248, %262 : vector<8x128xf32>
    %264 = vector.extract_strided_slice %28 {offsets = [0, 16], sizes = [8, 1], strides = [1, 1]} : vector<8x23xf32> to vector<8x1xf32>
    %265 = vector.extract_strided_slice %24 {offsets = [0, 16], sizes = [8, 1], strides = [1, 1]} : vector<8x23xf32> to vector<8x1xf32>
    %266 = vector.broadcast %265 : vector<8x1xf32> to vector<8x128xf32>
    %267 = arith.mulf %266, %7 : vector<8x128xf32>
    %268 = vector.broadcast %264 : vector<8x1xf32> to vector<8x128xf32>
    %269 = arith.addf %268, %267 : vector<8x128xf32>
    %270 = arith.mulf %263, %269 : vector<8x128xf32>
    %271 = arith.addf %215, %270 : vector<8x128xf32>
    %272 = vector.extract_strided_slice %0 {offsets = [0, 18], sizes = [8, 1], strides = [1, 1]} : vector<8x24xf32> to vector<8x1xf32>
    %273 = vector.broadcast %272 : vector<8x1xf32> to vector<8x128xf32>
    %274 = arith.cmpf oge, %4, %273 : vector<8x128xf32>
    %275 = arith.extui %274 : vector<8x128xi1> to vector<8x128xi32>
    %276 = arith.sitofp %275 : vector<8x128xi32> to vector<8x128xf32>
    %277 = arith.subf %262, %276 : vector<8x128xf32>
    %278 = vector.extract_strided_slice %28 {offsets = [0, 17], sizes = [8, 1], strides = [1, 1]} : vector<8x23xf32> to vector<8x1xf32>
    %279 = vector.extract_strided_slice %24 {offsets = [0, 17], sizes = [8, 1], strides = [1, 1]} : vector<8x23xf32> to vector<8x1xf32>
    %280 = vector.broadcast %279 : vector<8x1xf32> to vector<8x128xf32>
    %281 = arith.mulf %280, %7 : vector<8x128xf32>
    %282 = vector.broadcast %278 : vector<8x1xf32> to vector<8x128xf32>
    %283 = arith.addf %282, %281 : vector<8x128xf32>
    %284 = arith.mulf %277, %283 : vector<8x128xf32>
    %285 = arith.addf %229, %284 : vector<8x128xf32>
    %286 = vector.extract_strided_slice %0 {offsets = [0, 19], sizes = [8, 1], strides = [1, 1]} : vector<8x24xf32> to vector<8x1xf32>
    %287 = vector.broadcast %286 : vector<8x1xf32> to vector<8x128xf32>
    %288 = arith.cmpf oge, %4, %287 : vector<8x128xf32>
    %289 = arith.extui %288 : vector<8x128xi1> to vector<8x128xi32>
    %290 = arith.sitofp %289 : vector<8x128xi32> to vector<8x128xf32>
    %291 = arith.subf %276, %290 : vector<8x128xf32>
    %292 = vector.extract_strided_slice %28 {offsets = [0, 18], sizes = [8, 1], strides = [1, 1]} : vector<8x23xf32> to vector<8x1xf32>
    %293 = vector.extract_strided_slice %24 {offsets = [0, 18], sizes = [8, 1], strides = [1, 1]} : vector<8x23xf32> to vector<8x1xf32>
    %294 = vector.broadcast %293 : vector<8x1xf32> to vector<8x128xf32>
    %295 = arith.mulf %294, %7 : vector<8x128xf32>
    %296 = vector.broadcast %292 : vector<8x1xf32> to vector<8x128xf32>
    %297 = arith.addf %296, %295 : vector<8x128xf32>
    %298 = arith.mulf %291, %297 : vector<8x128xf32>
    %299 = arith.addf %243, %298 : vector<8x128xf32>
    %300 = vector.extract_strided_slice %0 {offsets = [0, 20], sizes = [8, 1], strides = [1, 1]} : vector<8x24xf32> to vector<8x1xf32>
    %301 = vector.broadcast %300 : vector<8x1xf32> to vector<8x128xf32>
    %302 = arith.cmpf oge, %4, %301 : vector<8x128xf32>
    %303 = arith.extui %302 : vector<8x128xi1> to vector<8x128xi32>
    %304 = arith.sitofp %303 : vector<8x128xi32> to vector<8x128xf32>
    %305 = arith.subf %290, %304 : vector<8x128xf32>
    %306 = vector.extract_strided_slice %28 {offsets = [0, 19], sizes = [8, 1], strides = [1, 1]} : vector<8x23xf32> to vector<8x1xf32>
    %307 = vector.extract_strided_slice %24 {offsets = [0, 19], sizes = [8, 1], strides = [1, 1]} : vector<8x23xf32> to vector<8x1xf32>
    %308 = vector.broadcast %307 : vector<8x1xf32> to vector<8x128xf32>
    %309 = arith.mulf %308, %7 : vector<8x128xf32>
    %310 = vector.broadcast %306 : vector<8x1xf32> to vector<8x128xf32>
    %311 = arith.addf %310, %309 : vector<8x128xf32>
    %312 = arith.mulf %305, %311 : vector<8x128xf32>
    %313 = arith.addf %257, %312 : vector<8x128xf32>
    %314 = vector.extract_strided_slice %0 {offsets = [0, 21], sizes = [8, 1], strides = [1, 1]} : vector<8x24xf32> to vector<8x1xf32>
    %315 = vector.broadcast %314 : vector<8x1xf32> to vector<8x128xf32>
    %316 = arith.cmpf oge, %4, %315 : vector<8x128xf32>
    %317 = arith.extui %316 : vector<8x128xi1> to vector<8x128xi32>
    %318 = arith.sitofp %317 : vector<8x128xi32> to vector<8x128xf32>
    %319 = arith.subf %304, %318 : vector<8x128xf32>
    %320 = vector.extract_strided_slice %28 {offsets = [0, 20], sizes = [8, 1], strides = [1, 1]} : vector<8x23xf32> to vector<8x1xf32>
    %321 = vector.extract_strided_slice %24 {offsets = [0, 20], sizes = [8, 1], strides = [1, 1]} : vector<8x23xf32> to vector<8x1xf32>
    %322 = vector.broadcast %321 : vector<8x1xf32> to vector<8x128xf32>
    %323 = arith.mulf %322, %7 : vector<8x128xf32>
    %324 = vector.broadcast %320 : vector<8x1xf32> to vector<8x128xf32>
    %325 = arith.addf %324, %323 : vector<8x128xf32>
    %326 = arith.mulf %319, %325 : vector<8x128xf32>
    %327 = arith.addf %271, %326 : vector<8x128xf32>
    %328 = vector.extract_strided_slice %0 {offsets = [0, 22], sizes = [8, 1], strides = [1, 1]} : vector<8x24xf32> to vector<8x1xf32>
    %329 = vector.broadcast %328 : vector<8x1xf32> to vector<8x128xf32>
    %330 = arith.cmpf oge, %4, %329 : vector<8x128xf32>
    %331 = arith.extui %330 : vector<8x128xi1> to vector<8x128xi32>
    %332 = arith.sitofp %331 : vector<8x128xi32> to vector<8x128xf32>
    %333 = arith.subf %318, %332 : vector<8x128xf32>
    %334 = vector.extract_strided_slice %28 {offsets = [0, 21], sizes = [8, 1], strides = [1, 1]} : vector<8x23xf32> to vector<8x1xf32>
    %335 = vector.extract_strided_slice %24 {offsets = [0, 21], sizes = [8, 1], strides = [1, 1]} : vector<8x23xf32> to vector<8x1xf32>
    %336 = vector.broadcast %335 : vector<8x1xf32> to vector<8x128xf32>
    %337 = arith.mulf %336, %7 : vector<8x128xf32>
    %338 = vector.broadcast %334 : vector<8x1xf32> to vector<8x128xf32>
    %339 = arith.addf %338, %337 : vector<8x128xf32>
    %340 = arith.mulf %333, %339 : vector<8x128xf32>
    %341 = arith.addf %285, %340 : vector<8x128xf32>
    %342 = vector.extract_strided_slice %0 {offsets = [0, 23], sizes = [8, 1], strides = [1, 1]} : vector<8x24xf32> to vector<8x1xf32>
    %343 = vector.broadcast %342 : vector<8x1xf32> to vector<8x128xf32>
    %344 = arith.cmpf oge, %4, %343 : vector<8x128xf32>
    %345 = arith.extui %344 : vector<8x128xi1> to vector<8x128xi32>
    %346 = arith.sitofp %345 : vector<8x128xi32> to vector<8x128xf32>
    %347 = arith.subf %332, %346 : vector<8x128xf32>
    %348 = vector.extract_strided_slice %28 {offsets = [0, 22], sizes = [8, 1], strides = [1, 1]} : vector<8x23xf32> to vector<8x1xf32>
    %349 = vector.extract_strided_slice %24 {offsets = [0, 22], sizes = [8, 1], strides = [1, 1]} : vector<8x23xf32> to vector<8x1xf32>
    %350 = vector.broadcast %349 : vector<8x1xf32> to vector<8x128xf32>
    %351 = arith.mulf %350, %7 : vector<8x128xf32>
    %352 = vector.broadcast %348 : vector<8x1xf32> to vector<8x128xf32>
    %353 = arith.addf %352, %351 : vector<8x128xf32>
    %354 = arith.mulf %347, %353 : vector<8x128xf32>
    %355 = arith.addf %299, %354 : vector<8x128xf32>
    %356 = arith.addf %327, %341 : vector<8x128xf32>
    %357 = arith.addf %355, %313 : vector<8x128xf32>
    %358 = arith.addf %356, %357 : vector<8x128xf32>
    %359 = vector.extract_strided_slice %0 {offsets = [0, 23], sizes = [8, 1], strides = [1, 1]} : vector<8x24xf32> to vector<8x1xf32>
    %360 = vector.broadcast %359 : vector<8x1xf32> to vector<8x128xf32>
    %361 = arith.cmpf oeq, %4, %360 : vector<8x128xf32>
    %362 = vector.extract_strided_slice %1 {offsets = [0, 23], sizes = [8, 1], strides = [1, 1]} : vector<8x24xf32> to vector<8x1xf32>
    %363 = vector.shape_cast %362 : vector<8x1xf32> to vector<8x1xf32>
    %364 = vector.broadcast %363 : vector<8x1xf32> to vector<8x128xf32>
    %365 = arith.select %361, %364, %358 : vector<8x128xi1>, vector<8x128xf32>
    %c0_10 = arith.constant 0 : index
    %c0_11 = arith.constant 0 : index
    %366 = vector.load %arg4[%c0_10, %c0_11] : memref<8x128xf32, #tpu.memory_space<vmem>>, vector<8x128xf32>
    tpu.vector_store %arg4[%c0_10, %c0_11], %365 {strides = array<i32>} : memref<8x128xf32, #tpu.memory_space<vmem>>, vector<8x128xf32>,
    return
  }
  func.func @transform_0(%arg0: i32) -> (i32, i32) {
    %c0_i32 = arith.constant 0 : i32
    %c0_i32_0 = arith.constant 0 : i32
    %c0_i32_1 = arith.constant 0 : i32
    return %c0_i32, %c0_i32_0 : i32, i32
  }
  func.func @transform_1(%arg0: i32) -> (i32, i32) {
    %c0_i32 = arith.constant 0 : i32
    %c0_i32_0 = arith.constant 0 : i32
    %c0_i32_1 = arith.constant 0 : i32
    return %c0_i32, %c0_i32_0 : i32, i32
  }
  func.func @transform_2(%arg0: i32) -> (i32, i32) {
    %c0_i32 = arith.constant 0 : i32
    %c0_i32_0 = arith.constant 0 : i32
    return %c0_i32, %arg0 : i32, i32
  }
  func.func @transform_3(%arg0: i32) -> (i32, i32) {
    %c0_i32 = arith.constant 0 : i32
    %c0_i32_0 = arith.constant 0 : i32
    return %c0_i32, %arg0 : i32, i32
  }
}

</mosaic_0001>

<bundles_post_ra>
// kernel: _resample_reshape.1
= control target key start
LH: loop header
LB: loop body
LE: loop exit
PB: predicated region body
PF: predicated region fallthrough
CT: control target
= control target key end

     0   :  { %8 = vsyncpa [#allocation3], 0  ;;  %s1209_s0 = inlined_call_operand.hbm [shape: f32[8,24], index: 0, kind: input, shape index: {}]   ;;  %s1210_s1 = inlined_call_operand.hbm [shape: f32[8,24], index: 1, kind: input, shape index: {}]   ;;  %s1211_s2 = inlined_call_operand.vmem [shape: f32[1,128], index: 2, kind: input, shape index: {}]   ;;  %s1212_s3 = inlined_call_operand.hbm [shape: f32[8,128], index: 3, kind: output, shape index: {}]  }
   0x1   :  { %9 = vsyncpa [#allocation6], 0 }
   0x2   :  { %10 = vsyncpa [#allocation4], 0  ;;  %s766_s12 = smov [#allocation2]   ;;  %s767_s14 = smov [#allocation5]  }
   0x3   :  { %s17_s13 = sshll.u32 %s766_s12, 4  ;;  %s27_s15 = sshll.u32 %s767_s14, 4  ;;  %s18_s13 = int_to_ptr.vmem [resolvable:$true] %s17_s13  ;;  %s28_s15 = int_to_ptr.vmem [resolvable:$true] %s27_s15 }
   0x4   :  { %s694_s18 = scalar_lea.hbm %s1209_s0, 128 }
   0x5   :  { %p695_p0 = scmp.ne.s32.totalorder %s1209_s0, %s694_s18  ;;  %p698_p1 = scmp.lt.u32.totalorder %s694_s18, %s1209_s0 }
   0x7   :  { %p700_p2 = pnand %p698_p1, %p695_p0 }
   0x9   :  { %703 = shalt.err (!%p700_p2)
}
   0xa   :  { %s704_s23 = scalar_lea.vmem %s18_s13, 128  ;;  %p709_p4 = scmp.lt.s32.totalorder %s18_s13, %s18_s13 }
   0xb   :  { %p705_p3 = scmp.ne.s32.totalorder %s18_s13, %s704_s23  ;;  %p710_p5 = scmp.lt.s32.totalorder %s704_s23, %s704_s23 }
   0xd   :  { %p711_p6 = por %p710_p5, %p709_p4 }
   0xf   :  { %p712_p7 = pnand %p711_p6, %p705_p3 }
  0x11   :  { %715 = shalt.err (!%p712_p7)
}
  0x12   :  { %20 = dma.hbm_to_vmem [thread:$0]  %s1209_s0, 128, %s18_s13, [#allocation3]  }
  0x13   :  { %s716_s28 = scalar_lea.hbm %s1210_s1, 128 }
  0x14   :  { %p717_p8 = scmp.ne.s32.totalorder %s1210_s1, %s716_s28  ;;  %p720_p9 = scmp.lt.u32.totalorder %s716_s28, %s1210_s1 }
  0x16   :  { %p722_p10 = pnand %p720_p9, %p717_p8 }
  0x18   :  { %725 = shalt.err (!%p722_p10)
}
  0x19   :  { %s726_s6 = scalar_lea.vmem %s28_s15, 128  ;;  %p731_p12 = scmp.lt.s32.totalorder %s28_s15, %s28_s15 }
  0x1a   :  { %p727_p11 = scmp.ne.s32.totalorder %s28_s15, %s726_s6  ;;  %p732_p13 = scmp.lt.s32.totalorder %s726_s6, %s726_s6 }
  0x1c   :  { %p733_p0 = por %p732_p13, %p731_p12 }
  0x1e   :  { %p734_p1 = pnand %p733_p0, %p727_p11 }
  0x20   :  { %737 = shalt.err (!%p734_p1)
}
  0x21   :  { %30 = dma.hbm_to_vmem [thread:$0]  %s1210_s1, 128, %s28_s15, [#allocation6]  }
  0x22   :  { %760 = dma.done.wait [#allocation3], 128  }
  0x23   :  { %761 = vsyncadd [#allocation3], 4294967168 }
  0x24   :  { %762 = dma.done.wait [#allocation6], 128  }
  0x25   :  { %763 = vsyncadd [#allocation6], 4294967168  ;;  %v768_v0 = vmov 0   ;;  %v841_v1 = vld [vmem:[#allocation2] sm:$0xff]  ;;  %v769_v2 = vmov 1   ;;  %v846_v3 = vld [vmem:[#allocation5] sm:$0xff] }
  0x26   :  { %621 = vset.pattern.permute.xlu0 %v768_v0  ;;  %s770_s8 = smov 1   ;;  %v771_v4 = vmov 2   ;;  %v772_v5 = vmov 3   ;;  %v773_v6 = vmov 4   ;;  %v774_v7 = vmov 5   ;;  %s795_s10 = smov [#allocation7]  }
  0x27   :  { %50 = vperm.xlu0 %621, %v841_v1   ;;  %61 = vrot.lane.b32.xlu1 %v846_v3, %s770_s8  ;;  %v775_v8 = vmov 18   ;;  %v776_v9 = vmov 19   ;;  %v777_v10 = vmov 21   ;;  %v778_v11 = vmov 22   ;;  %v869_v13 = vld [vmem:[%s1211_s2] ss:$0 sm:$0xff] }
  0x28   :  { %639 = vset.pattern.permute.xlu1 %v775_v8  ;;  %v779_v16 = vmov 0.0   ;;  %v780_v21 = vmov 6   ;;  %v781_v25 = vmov 7   ;;  %v782_v28 = vmov 8   ;;  %s794_s2 = smov 127   ;;  %s556_s11 = sshll.u32 %s795_s10, 4  ;;  %s557_s11 = int_to_ptr.vmem [resolvable:$true] %s556_s11 }
  0x29   :  { %v783_v29 = vmov 9   ;;  %v784_v30 = vmov 10   ;;  %v785_v31 = vmov 11   ;;  %v786_v32 = vmov 12   ;;  %s738_s12 = scalar_lea.vmem %s557_s11, 128  ;;  %p743_p3 = scmp.lt.s32.totalorder %s557_s11, %s557_s11 }
  0x2a   :  { %v787_v33 = vmov 13   ;;  %v788_v34 = vmov 14   ;;  %v789_v35 = vmov 15   ;;  %v790_v36 = vmov 16   ;;  %p739_p2 = scmp.ne.s32.totalorder %s557_s11, %s738_s12  ;;  %p744_p4 = scmp.lt.s32.totalorder %s738_s12, %s738_s12 }
  0x2b   :  { %622 = vset.pattern.permute.xlu0 %v769_v2  ;;  %421 = vperm.xlu1 %639, %v841_v1   ;;  %v791_v37 = vmov 17   ;;  %v792_v38 = vmov 20   ;;  %v793_v39 = vmov 23  }
  0x2c   :  { %79 = vperm.xlu0 %622, %v841_v1   ;;  %p745_p5 = por %p744_p4, %p743_p3 }
  0x2e   :  { %p746_p6 = pnand %p745_p5, %p739_p2 }
  0x2f   :  { %640 = vset.pattern.permute.xlu1 %v776_v9 }
  0x30   :  { %623 = vset.pattern.permute.xlu0 %v771_v4  ;;  %441 = vperm.xlu1 %640, %v841_v1  }
  0x31   :  { %101 = vperm.xlu0 %623, %v841_v1  }
  0x34   :  { %642 = vset.pattern.permute.xlu1 %v777_v10 }
  0x35   :  { %624 = vset.pattern.permute.xlu0 %v772_v5  ;;  %481 = vperm.xlu1 %642, %v841_v1  }
  0x36   :  { %121 = vperm.xlu0 %624, %v841_v1  }
  0x39   :  { %643 = vset.pattern.permute.xlu1 %v778_v11 }
  0x3a   :  { %625 = vset.pattern.permute.xlu0 %v773_v6  ;;  %501 = vperm.xlu1 %643, %v841_v1  }
  0x3b   :  { %141 = vperm.xlu0 %625, %v841_v1  }
  0x3e   :  { %645 = vset.pattern.permute.xlu1 %v769_v2 }
  0x3f   :  { %626 = vset.pattern.permute.xlu0 %v774_v7 }
  0x99   :  { %v62_v40 = vpop.permute.xlu1 %61 }
  0x9a   :  { %v64_v50 = vsub.f32 %v846_v3, %v62_v40 }
  0xa6   :  { %v864_v12 = vpop.permute.xlu0 %50 }
  0xa7   :  { %v873_v14 = vsub.f32 %v841_v1, %v864_v12  ;;  %vm75_vm0 = vcmp.ge.f32.partialorder %v869_v13, %v864_v12  ;;  %v970_v56 = vsub.f32 %v869_v13, %v864_v12 }
  0xa8   :  { %v881_v17 = vsel %vm75_vm0, 1.0, %v779_v16 }
  0xa9   :  { %56 = vrot.lane.b32.xlu0 %v873_v14, %s770_s8 }
  0xaa   :  { %v422_v41 = vpop.permute.xlu1 %421 }
  0xab   :  { %v80_v15 = vpop.permute.xlu0 %79  ;;  %vm424_vm4 = vcmp.ge.f32.partialorder %v869_v13, %v422_v41 }
  0xac   :  { %vm82_vm1 = vcmp.ge.f32.partialorder %v869_v13, %v80_v15  ;;  %v931_v42 = vsel %vm424_vm4, 1.0, %v779_v16 }
  0xad   :  { %v884_v18 = vsel %vm82_vm1, 1.0, %v779_v16  ;;  %161 = vperm.xlu0 %626, %v841_v1  }
  0xae   :  { %v85_v19 = vsub.f32 %v881_v17, %v884_v18 }
  0xaf   :  { %v442_v43 = vpop.permute.xlu1 %441 }
  0xb0   :  { %v102_v20 = vpop.permute.xlu0 %101  ;;  %vm444_vm5 = vcmp.ge.f32.partialorder %v869_v13, %v442_v43 }
  0xb1   :  { %627 = vset.pattern.permute.xlu0 %v780_v21  ;;  %vm104_vm2 = vcmp.ge.f32.partialorder %v869_v13, %v102_v20  ;;  %v937_v45 = vsel %vm444_vm5, 1.0, %v779_v16 }
  0xb2   :  { %181 = vperm.xlu0 %627, %v841_v1   ;;  %v893_v22 = vsel %vm104_vm2, 1.0, %v779_v16 }
  0xb3   :  { %v107_v23 = vsub.f32 %v884_v18, %v893_v22 }
  0xb4   :  { %v964_v54 = vpop.permute.xlu1 %481 }
  0xb5   :  { %v122_v24 = vpop.permute.xlu0 %121  ;;  %vm484_vm7 = vcmp.ge.f32.partialorder %v869_v13, %v964_v54 }
  0xb6   :  { %628 = vset.pattern.permute.xlu0 %v781_v25  ;;  %vm124_vm3 = vcmp.ge.f32.partialorder %v869_v13, %v122_v24 }
  0xb7   :  { %201 = vperm.xlu0 %628, %v841_v1   ;;  %v901_v26 = vsel %vm124_vm3, 1.0, %v779_v16 }
  0xb9   :  { %v966_v55 = vpop.permute.xlu1 %501 }
  0xba   :  { %v934_v44 = vpop.permute.xlu0 %141 }
  0xbb   :  { %629 = vset.pattern.permute.xlu0 %v782_v28  ;;  %vm144_vm9 = vcmp.ge.f32.partialorder %v869_v13, %v934_v44 }
  0xbc   :  { %221 = vperm.xlu0 %629, %v841_v1  }
  0xc0   :  { %630 = vset.pattern.permute.xlu0 %v783_v29 }
  0xc1   :  { %241 = vperm.xlu0 %630, %v841_v1  }
  0xc5   :  { %631 = vset.pattern.permute.xlu0 %v784_v30 }
  0xc6   :  { %261 = vperm.xlu0 %631, %v841_v1  }
  0xca   :  { %632 = vset.pattern.permute.xlu0 %v785_v31 }
  0xcb   :  { %281 = vperm.xlu0 %632, %v841_v1  }
  0xcf   :  { %633 = vset.pattern.permute.xlu0 %v786_v32 }
  0xd0   :  { %301 = vperm.xlu0 %633, %v841_v1  }
  0xd4   :  { %634 = vset.pattern.permute.xlu0 %v787_v33 }
  0xd5   :  { %321 = vperm.xlu0 %634, %v841_v1  }
  0xd9   :  { %635 = vset.pattern.permute.xlu0 %v788_v34 }
  0xda   :  { %341 = vperm.xlu0 %635, %v841_v1  }
  0xde   :  { %636 = vset.pattern.permute.xlu0 %v789_v35 }
  0xdf   :  { %361 = vperm.xlu0 %636, %v841_v1  }
  0xe3   :  { %637 = vset.pattern.permute.xlu0 %v790_v36 }
  0xe4   :  { %381 = vperm.xlu0 %637, %v841_v1  }
  0xe8   :  { %638 = vset.pattern.permute.xlu0 %v791_v37 }
  0xe9   :  { %401 = vperm.xlu0 %638, %v841_v1  }
  0xed   :  { %641 = vset.pattern.permute.xlu0 %v792_v38 }
  0xee   :  { %461 = vperm.xlu0 %641, %v841_v1  }
  0xf2   :  { %644 = vset.pattern.permute.xlu0 %v793_v39 }
  0xf3   :  { %521 = vperm.xlu0 %644, %v841_v1  }
  0xf7   :  { %662 = vset.pattern.permute.xlu0 %v775_v8 }
 0x11b   :  { %v57_v47 = vpop.permute.xlu0 %56 }
 0x11c   :  { %v59_v48 = vsub.f32 %v873_v14, %v57_v47 }
 0x11e   :  { %vm65_vm6 = vcmp.eq.f32.partialorder %v59_v48, 0.0 }
 0x11f   :  { %v66_v49 = vsel %vm65_vm6, 1.0, %v59_v48 }
 0x120   :  { %692 = vrcp.f32 %v66_v49 }
 0x12a   :  { %v693_v51 = vpop.eup %692 }
 0x12b   :  { %v68_v52 = vmul.f32 %v693_v51, %v64_v50 }
 0x12d   :  { %429 = vperm.xlu0 %662, %v68_v52   ;;  %88 = vperm.xlu1 %645, %v68_v52   ;;  %v69_v53 = vmul.f32 %v68_v52, %v57_v47 }
 0x131   :  { %665 = vset.pattern.permute.xlu0 %v777_v10  ;;  %646 = vset.pattern.permute.xlu1 %v771_v4 }
 0x132   :  { %489 = vperm.xlu0 %665, %v68_v52   ;;  %109 = vperm.xlu1 %646, %v68_v52  }
 0x136   :  { %647 = vset.pattern.permute.xlu1 %v772_v5  ;;  %684 = vset.pattern.permute.xlu0 %v790_v36 }
 0x137   :  { %129 = vperm.xlu1 %647, %v68_v52  }
 0x13b   :  { %648 = vset.pattern.permute.xlu1 %v773_v6 }
 0x13c   :  { %149 = vperm.xlu1 %648, %v68_v52  }
 0x140   :  { %649 = vset.pattern.permute.xlu1 %v774_v7 }
 0x141   :  { %169 = vperm.xlu1 %649, %v68_v52  }
 0x145   :  { %650 = vset.pattern.permute.xlu1 %v780_v21 }
 0x146   :  { %189 = vperm.xlu1 %650, %v68_v52  }
 0x14a   :  { %651 = vset.pattern.permute.xlu1 %v781_v25 }
 0x14b   :  { %209 = vperm.xlu1 %651, %v68_v52  }
 0x14f   :  { %652 = vset.pattern.permute.xlu1 %v782_v28 }
 0x150   :  { %229 = vperm.xlu1 %652, %v68_v52  }
 0x154   :  { %653 = vset.pattern.permute.xlu1 %v783_v29 }
 0x155   :  { %249 = vperm.xlu1 %653, %v68_v52  }
 0x159   :  { %654 = vset.pattern.permute.xlu1 %v784_v30 }
 0x15a   :  { %269 = vperm.xlu1 %654, %v68_v52  }
 0x15e   :  { %655 = vset.pattern.permute.xlu1 %v785_v31 }
 0x15f   :  { %289 = vperm.xlu1 %655, %v68_v52  }
 0x163   :  { %656 = vset.pattern.permute.xlu1 %v786_v32 }
 0x164   :  { %309 = vperm.xlu1 %656, %v68_v52  }
 0x168   :  { %657 = vset.pattern.permute.xlu1 %v787_v33 }
 0x169   :  { %329 = vperm.xlu1 %657, %v68_v52  }
 0x16d   :  { %658 = vset.pattern.permute.xlu1 %v788_v34 }
 0x16e   :  { %349 = vperm.xlu1 %658, %v68_v52  }
 0x172   :  { %659 = vset.pattern.permute.xlu1 %v789_v35 }
 0x173   :  { %369 = vperm.xlu1 %659, %v68_v52  }
 0x177   :  { %660 = vset.pattern.permute.xlu1 %v790_v36 }
 0x178   :  { %389 = vperm.xlu1 %660, %v68_v52  }
 0x17c   :  { %661 = vset.pattern.permute.xlu1 %v791_v37 }
 0x17d   :  { %409 = vperm.xlu1 %661, %v68_v52  }
 0x181   :  { %663 = vset.pattern.permute.xlu1 %v776_v9 }
 0x182   :  { %449 = vperm.xlu1 %663, %v68_v52  }
 0x186   :  { %664 = vset.pattern.permute.xlu1 %v792_v38 }
 0x187   :  { %469 = vperm.xlu1 %664, %v68_v52  }
 0x18b   :  { %666 = vset.pattern.permute.xlu1 %v778_v11 }
 0x18c   :  { %509 = vperm.xlu1 %666, %v68_v52  }
 0x190   :  { %667 = vset.pattern.permute.xlu1 %v793_v39 }
 0x191   :  { %529 = vperm.xlu1 %667, %v68_v52  }
 0x195   :  { %71 = vrot.lane.b32.xlu1 %v69_v53, %s794_s2 }
 0x196   :  { %668 = vset.pattern.permute.xlu1 %v768_v0 }
 0x1ac   :  { %v89_v57 = vpop.permute.xlu1 %88 }
 0x1ad   :  { %v973_v58 = vmul.f32 %v89_v57, %v970_v56 }
 0x1b1   :  { %v110_v59 = vpop.permute.xlu1 %109 }
 0x1b2   :  { %v976_v60 = vmul.f32 %v110_v59, %v970_v56 }
 0x1b6   :  { %v130_v61 = vpop.permute.xlu1 %129 }
 0x1b7   :  { %v979_v62 = vmul.f32 %v130_v61, %v970_v56 }
 0x1bb   :  { %v150_v63 = vpop.permute.xlu1 %149 }
 0x1bc   :  { %v982_v0 = vmul.f32 %v150_v63, %v970_v56 }
 0x1c0   :  { %v170_v1 = vpop.permute.xlu1 %169 }
 0x1c1   :  { %v985_v12 = vmul.f32 %v170_v1, %v970_v56 }
 0x1c5   :  { %v190_v14 = vpop.permute.xlu1 %189 }
 0x1c6   :  { %v988_v15 = vmul.f32 %v190_v14, %v970_v56 }
 0x1ca   :  { %v210_v20 = vpop.permute.xlu1 %209 }
 0x1cb   :  { %v991_v24 = vmul.f32 %v210_v20, %v970_v56 }
 0x1cf   :  { %v230_v36 = vpop.permute.xlu1 %229 }
 0x1d0   :  { %v994_v40 = vmul.f32 %v230_v36, %v970_v56 }
 0x1d4   :  { %v250_v41 = vpop.permute.xlu1 %249 }
 0x1d5   :  { %v997_v43 = vmul.f32 %v250_v41, %v970_v56 }
 0x1d9   :  { %v270_v47 = vpop.permute.xlu1 %269 }
 0x1da   :  { %v1000_v48 = vmul.f32 %v270_v47, %v970_v56 }
 0x1de   :  { %v290_v49 = vpop.permute.xlu1 %289 }
 0x1df   :  { %v1003_v50 = vmul.f32 %v290_v49, %v970_v56 }
 0x1e3   :  { %v310_v51 = vpop.permute.xlu1 %309 }
 0x1e4   :  { %v1006_v52 = vmul.f32 %v310_v51, %v970_v56 }
 0x1e8   :  { %v330_v53 = vpop.permute.xlu1 %329 }
 0x1e9   :  { %v1009_v57 = vmul.f32 %v330_v53, %v970_v56 }
 0x1ed   :  { %v350_v59 = vpop.permute.xlu1 %349 }
 0x1ee   :  { %v1012_v61 = vmul.f32 %v350_v59, %v970_v56 }
 0x1f2   :  { %v370_v63 = vpop.permute.xlu1 %369 }
 0x1f3   :  { %v1015_v1 = vmul.f32 %v370_v63, %v970_v56 }
 0x1f7   :  { %v390_v14 = vpop.permute.xlu1 %389 }
 0x1f8   :  { %v1018_v20 = vmul.f32 %v390_v14, %v970_v56 }
 0x1fc   :  { %v410_v36 = vpop.permute.xlu1 %409 }
 0x1fd   :  { %v1021_v41 = vmul.f32 %v410_v36, %v970_v56 }
 0x201   :  { %v450_v47 = vpop.permute.xlu1 %449 }
 0x202   :  { %v1024_v49 = vmul.f32 %v450_v47, %v970_v56 }
 0x206   :  { %v470_v51 = vpop.permute.xlu1 %469 }
 0x207   :  { %v1027_v53 = vmul.f32 %v470_v51, %v970_v56 }
 0x20b   :  { %v510_v59 = vpop.permute.xlu1 %509 }
 0x20c   :  { %v1030_v63 = vmul.f32 %v510_v59, %v970_v56 }
 0x210   :  { %v530_v46 = vpop.permute.xlu1 %529 }
 0x211   :  { %v1033_v14 = vmul.f32 %v530_v46, %v970_v56 }
 0x214   :  { %v72_v27 = vpop.permute.xlu1 %71 }
 0x215   :  { %v74_v36 = vsub.f32 %v846_v3, %v72_v27 }
 0x217   :  { %414 = vperm.xlu0 %684, %v74_v36   ;;  %94 = vperm.xlu1 %668, %v74_v36  }
 0x21b   :  { %688 = vset.pattern.permute.xlu0 %v792_v38  ;;  %669 = vset.pattern.permute.xlu1 %v769_v2  ;;  %v1045_v2 = vpop.permute.xlu0 %161 }
 0x21c   :  { %494 = vperm.xlu0 %688, %v74_v36   ;;  %114 = vperm.xlu1 %669, %v74_v36   ;;  %vm164_vm10 = vcmp.ge.f32.partialorder %v869_v13, %v1045_v2 }
 0x220   :  { %670 = vset.pattern.permute.xlu1 %v771_v4  ;;  %691 = vset.pattern.permute.xlu0 %v793_v39  ;;  %v1048_v4 = vpop.permute.xlu0 %181 }
 0x221   :  { %134 = vperm.xlu1 %670, %v74_v36   ;;  %545 = vperm.xlu0 %691, %v846_v3   ;;  %vm184_vm11 = vcmp.ge.f32.partialorder %v869_v13, %v1048_v4 }
 0x224   :  { %v1051_v3 = vpop.permute.xlu0 %201 }
 0x225   :  { %671 = vset.pattern.permute.xlu1 %v772_v5  ;;  %vm204_vm12 = vcmp.ge.f32.partialorder %v869_v13, %v1051_v3 }
 0x226   :  { %154 = vperm.xlu1 %671, %v74_v36  }
 0x228   :  { %v1054_v5 = vpop.permute.xlu0 %221 }
 0x229   :  { %vm224_vm13 = vcmp.ge.f32.partialorder %v869_v13, %v1054_v5 }
 0x22a   :  { %672 = vset.pattern.permute.xlu1 %v773_v6 }
 0x22b   :  { %174 = vperm.xlu1 %672, %v74_v36  }
 0x22c   :  { %v1057_v6 = vpop.permute.xlu0 %241 }
 0x22d   :  { %vm244_vm14 = vcmp.ge.f32.partialorder %v869_v13, %v1057_v6 }
 0x22f   :  { %673 = vset.pattern.permute.xlu1 %v774_v7 }
 0x230   :  { %194 = vperm.xlu1 %673, %v74_v36   ;;  %v1060_v7 = vpop.permute.xlu0 %261 }
 0x231   :  { %vm264_vm15 = vcmp.ge.f32.partialorder %v869_v13, %v1060_v7 }
 0x234   :  { %674 = vset.pattern.permute.xlu1 %v780_v21  ;;  %v1064_v21 = vpop.permute.xlu0 %281 }
 0x235   :  { %214 = vperm.xlu1 %674, %v74_v36   ;;  %vm284_vm0 = vcmp.ge.f32.partialorder %v869_v13, %v1064_v21 }
 0x239   :  { %675 = vset.pattern.permute.xlu1 %v781_v25  ;;  %v1067_v25 = vpop.permute.xlu0 %301 }
 0x23a   :  { %234 = vperm.xlu1 %675, %v74_v36   ;;  %vm304_vm1 = vcmp.ge.f32.partialorder %v869_v13, %v1067_v25 }
 0x23d   :  { %v1070_v27 = vpop.permute.xlu0 %321 }
 0x23e   :  { %676 = vset.pattern.permute.xlu1 %v782_v28  ;;  %vm324_vm2 = vcmp.ge.f32.partialorder %v869_v13, %v1070_v27 }
 0x23f   :  { %254 = vperm.xlu1 %676, %v74_v36   ;;  %v580_v25 = vsel %vm324_vm2, 1.0, %v779_v16 }
 0x241   :  { %v1073_v28 = vpop.permute.xlu0 %341 }
 0x242   :  { %vm344_vm5 = vcmp.ge.f32.partialorder %v869_v13, %v1073_v28 }
 0x243   :  { %677 = vset.pattern.permute.xlu1 %v783_v29 }
 0x244   :  { %274 = vperm.xlu1 %677, %v74_v36  }
 0x245   :  { %v1076_v29 = vpop.permute.xlu0 %361 }
 0x246   :  { %vm364_vm6 = vcmp.ge.f32.partialorder %v869_v13, %v1076_v29 }
 0x248   :  { %678 = vset.pattern.permute.xlu1 %v784_v30 }
 0x249   :  { %294 = vperm.xlu1 %678, %v74_v36   ;;  %v1080_v30 = vpop.permute.xlu0 %381 }
 0x24a   :  { %vm384_vm3 = vcmp.ge.f32.partialorder %v869_v13, %v1080_v30 }
 0x24d   :  { %679 = vset.pattern.permute.xlu1 %v785_v31  ;;  %v1083_v31 = vpop.permute.xlu0 %401 }
 0x24e   :  { %314 = vperm.xlu1 %679, %v74_v36   ;;  %vm404_vm4 = vcmp.ge.f32.partialorder %v869_v13, %v1083_v31  ;;  %v581_v31 = vsel %vm344_vm5, 1.0, %v779_v16 }
 0x24f   :  { %v584_v27 = vsel %vm404_vm4, 1.0, %v779_v16 }
 0x252   :  { %680 = vset.pattern.permute.xlu1 %v786_v32  ;;  %v462_v32 = vpop.permute.xlu0 %461 }
 0x253   :  { %334 = vperm.xlu1 %680, %v74_v36   ;;  %vm464_vm8 = vcmp.ge.f32.partialorder %v869_v13, %v462_v32  ;;  %v571_v32 = vsel %vm144_vm9, 1.0, %v779_v16 }
 0x254   :  { %v1103_v39 = vsel %vm464_vm8, 1.0, %v779_v16  ;;  %v147_v18 = vsub.f32 %v901_v26, %v571_v32 }
 0x257   :  { %681 = vset.pattern.permute.xlu1 %v787_v33  ;;  %v1085_v33 = vpop.permute.xlu0 %521 }
 0x258   :  { %354 = vperm.xlu1 %681, %v74_v36   ;;  %vm524_vm8 = vcmp.ge.f32.partialorder %v869_v13, %v1085_v33  ;;  %vm543_vm9 = vcmp.eq.f32.partialorder %v869_v13, %v1085_v33 }
 0x25c   :  { %682 = vset.pattern.permute.xlu1 %v788_v34 }
 0x25d   :  { %374 = vperm.xlu1 %682, %v74_v36  }
 0x261   :  { %683 = vset.pattern.permute.xlu1 %v789_v35 }
 0x262   :  { %394 = vperm.xlu1 %683, %v74_v36  }
 0x266   :  { %685 = vset.pattern.permute.xlu1 %v791_v37 }
 0x267   :  { %434 = vperm.xlu1 %685, %v74_v36  }
 0x26b   :  { %686 = vset.pattern.permute.xlu1 %v775_v8  ;;  %v1087_v8 = vpop.permute.xlu0 %429 }
 0x26c   :  { %454 = vperm.xlu1 %686, %v74_v36  }
 0x26f   :  { %v490_v34 = vpop.permute.xlu0 %489 }
 0x270   :  { %687 = vset.pattern.permute.xlu1 %v776_v9  ;;  %v492_v38 = vmul.f32 %v490_v34, %v970_v56  ;;  %v1213_v34 = vsub.f32 %v893_v22, %v901_v26  ;;  %v573_v22 = vsel %vm184_vm11, 1.0, %v779_v16 }
 0x271   :  { %474 = vperm.xlu1 %687, %v74_v36  }
 0x275   :  { %689 = vset.pattern.permute.xlu1 %v777_v10 }
 0x276   :  { %514 = vperm.xlu1 %689, %v74_v36  }
 0x27a   :  { %690 = vset.pattern.permute.xlu1 %v778_v11  ;;  %v1096_v11 = vsel %vm484_vm7, 1.0, %v779_v16  ;;  %vm504_vm7 = vcmp.ge.f32.partialorder %v869_v13, %v966_v55  ;;  %v590_v55 = vsel %vm524_vm8, 1.0, %v779_v16 }
 0x27b   :  { %534 = vperm.xlu1 %690, %v74_v36   ;;  %v487_v47 = vsub.f32 %v1103_v39, %v1096_v11 }
 0x296   :  { %v95_v9 = vpop.permute.xlu1 %94  ;;  %v1091_v35 = vpop.permute.xlu0 %414 }
 0x297   :  { %v97_v10 = vadd.f32 %v95_v9, %v973_v58 }
 0x299   :  { %v98_v37 = vmul.f32 %v97_v10, %v85_v19  ;;  %v572_v10 = vsel %vm164_vm10, 1.0, %v779_v16 }
 0x29b   :  { %v115_v46 = vpop.permute.xlu1 %114  ;;  %v495_v54 = vpop.permute.xlu0 %494 }
 0x29c   :  { %v117_v58 = vadd.f32 %v115_v46, %v976_v60  ;;  %v497_v51 = vadd.f32 %v495_v54, %v492_v38  ;;  %v167_v38 = vsub.f32 %v571_v32, %v572_v10  ;;  %v575_v32 = vsel %vm224_vm13, 1.0, %v779_v16 }
 0x29e   :  { %v118_v59 = vmul.f32 %v117_v58, %v107_v23  ;;  %v1111_v36 = vmul.f32 %v497_v51, %v487_v47  ;;  %v187_v47 = vsub.f32 %v572_v10, %v573_v22  ;;  %v574_v58 = vsel %vm204_vm12, 1.0, %v779_v16 }
 0x2a0   :  { %v135_v17 = vpop.permute.xlu1 %134 }
 0x2a1   :  { %v137_v19 = vadd.f32 %v135_v17, %v979_v62 }
 0x2a3   :  { %v138_v9 = vmul.f32 %v137_v19, %v1213_v34 }
 0x2a5   :  { %v155_v60 = vpop.permute.xlu1 %154 }
 0x2a6   :  { %v157_v23 = vadd.f32 %v155_v60, %v982_v0 }
 0x2a8   :  { %v158_v44 = vmul.f32 %v157_v23, %v147_v18  ;;  %v576_v18 = vsel %vm244_vm14, 1.0, %v779_v16 }
 0x2aa   :  { %v175_v62 = vpop.permute.xlu1 %174 }
 0x2ab   :  { %v177_v46 = vadd.f32 %v175_v62, %v985_v12  ;;  %v207_v12 = vsub.f32 %v573_v22, %v574_v58  ;;  %v577_v62 = vsel %vm264_vm15, 1.0, %v779_v16  ;;  %v578_v22 = vsel %vm284_vm0, 1.0, %v779_v16 }
 0x2ad   :  { %v178_v54 = vmul.f32 %v177_v46, %v167_v38 }
 0x2af   :  { %v179_v2 = vadd.f32 %v178_v54, %v98_v37  ;;  %v195_v26 = vpop.permute.xlu1 %194 }
 0x2b0   :  { %v197_v0 = vadd.f32 %v195_v26, %v988_v15  ;;  %v227_v15 = vsub.f32 %v574_v58, %v575_v32 }
 0x2b2   :  { %v198_v51 = vmul.f32 %v197_v0, %v187_v47  ;;  %v579_v47 = vsel %vm304_vm1, 1.0, %v779_v16 }
 0x2b4   :  { %v199_v4 = vadd.f32 %v198_v51, %v118_v59  ;;  %v215_v17 = vpop.permute.xlu1 %214 }
 0x2b5   :  { %v217_v19 = vadd.f32 %v215_v17, %v991_v24  ;;  %v247_v24 = vsub.f32 %v575_v32, %v576_v18  ;;  %v327_v17 = vsub.f32 %v579_v47, %v580_v25 }
 0x2b7   :  { %v218_v34 = vmul.f32 %v217_v19, %v207_v12 }
 0x2b9   :  { %v219_v3 = vadd.f32 %v218_v34, %v138_v9  ;;  %v235_v37 = vpop.permute.xlu1 %234 }
 0x2ba   :  { %v237_v60 = vadd.f32 %v235_v37, %v994_v40  ;;  %v267_v40 = vsub.f32 %v576_v18, %v577_v62  ;;  %v347_v37 = vsub.f32 %v580_v25, %v581_v31  ;;  %v582_v18 = vsel %vm364_vm6, 1.0, %v779_v16 }
 0x2bc   :  { %v238_v23 = vmul.f32 %v237_v60, %v227_v15 }
 0x2be   :  { %v239_v5 = vadd.f32 %v238_v23, %v158_v44  ;;  %v255_v59 = vpop.permute.xlu1 %254 }
 0x2bf   :  { %v257_v10 = vadd.f32 %v255_v59, %v997_v43  ;;  %v287_v43 = vsub.f32 %v577_v62, %v578_v22 }
 0x2c1   :  { %v258_v38 = vmul.f32 %v257_v10, %v247_v24 }
 0x2c3   :  { %v259_v6 = vadd.f32 %v258_v38, %v179_v2  ;;  %v275_v9 = vpop.permute.xlu1 %274  ;;  %v307_v2 = vsub.f32 %v578_v22, %v579_v47  ;;  %v589_v47 = vsel %vm504_vm7, 1.0, %v779_v16 }
 0x2c4   :  { %v277_v46 = vadd.f32 %v275_v9, %v1000_v48 }
 0x2c6   :  { %v278_v54 = vmul.f32 %v277_v46, %v267_v40  ;;  %v427_v46 = vsub.f32 %v584_v27, %v931_v42 }
 0x2c8   :  { %v279_v7 = vadd.f32 %v278_v54, %v199_v4  ;;  %v295_v44 = vpop.permute.xlu1 %294 }
 0x2c9   :  { %v297_v26 = vadd.f32 %v295_v44, %v1003_v50  ;;  %v583_v50 = vsel %vm384_vm3, 1.0, %v779_v16  ;;  %v1214_v44 = vsub.f32 %v931_v42, %v937_v45  ;;  %v507_v42 = vsub.f32 %v1096_v11, %v589_v47 }
 0x2ca   :  { %v407_v12 = vsub.f32 %v583_v50, %v584_v27  ;;  %v387_v62 = vsub.f32 %v582_v18, %v583_v50 }
 0x2cb   :  { %v298_v0 = vmul.f32 %v297_v26, %v287_v43 }
 0x2cd   :  { %v299_v48 = vadd.f32 %v298_v0, %v219_v3  ;;  %v315_v21 = vpop.permute.xlu1 %314 }
 0x2ce   :  { %v317_v58 = vadd.f32 %v315_v21, %v1006_v52  ;;  %v417_v52 = vadd.f32 %v1091_v35, %v1021_v41 }
 0x2d0   :  { %v318_v51 = vmul.f32 %v317_v58, %v307_v2  ;;  %v418_v34 = vmul.f32 %v417_v52, %v407_v12 }
 0x2d2   :  { %v319_v4 = vadd.f32 %v318_v51, %v239_v5  ;;  %v335_v30 = vpop.permute.xlu1 %334  ;;  %v367_v5 = vsub.f32 %v581_v31, %v582_v18 }
 0x2d3   :  { %v337_v19 = vadd.f32 %v335_v30, %v1009_v57 }
 0x2d5   :  { %v338_v32 = vmul.f32 %v337_v19, %v327_v17 }
 0x2d7   :  { %v339_v3 = vadd.f32 %v338_v32, %v259_v6  ;;  %v355_v28 = vpop.permute.xlu1 %354 }
 0x2d8   :  { %v357_v15 = vadd.f32 %v355_v28, %v1012_v61  ;;  %v432_v61 = vmul.f32 %v1087_v8, %v970_v56  ;;  %v467_v56 = vsub.f32 %v937_v45, %v1103_v39  ;;  %v527_v45 = vsub.f32 %v589_v47, %v590_v55 }
 0x2d9   :  { %v419_v60 = vadd.f32 %v418_v34, %v339_v3 }
 0x2da   :  { %v358_v23 = vmul.f32 %v357_v15, %v347_v37 }
 0x2db   :  { %v499_v41 = vadd.f32 %v1111_v36, %v419_v60 }
 0x2dc   :  { %v359_v35 = vadd.f32 %v358_v23, %v279_v7  ;;  %v375_v57 = vpop.permute.xlu1 %374 }
 0x2dd   :  { %v377_v59 = vadd.f32 %v375_v57, %v1015_v1 }
 0x2df   :  { %v378_v24 = vmul.f32 %v377_v59, %v367_v5 }
 0x2e1   :  { %v379_v10 = vadd.f32 %v378_v24, %v299_v48  ;;  %v395_v29 = vpop.permute.xlu1 %394 }
 0x2e2   :  { %v397_v38 = vadd.f32 %v395_v29, %v1018_v20 }
 0x2e4   :  { %v398_v6 = vmul.f32 %v397_v38, %v387_v62 }
 0x2e6   :  { %v399_v9 = vadd.f32 %v398_v6, %v319_v4  ;;  %v435_v40 = vpop.permute.xlu1 %434  ;;  %v546_v4 = vpop.permute.xlu0 %545 }
 0x2e7   :  { %v437_v36 = vadd.f32 %v435_v40, %v432_v61 }
 0x2e9   :  { %v438_v22 = vmul.f32 %v437_v36, %v427_v46 }
 0x2eb   :  { %v439_v54 = vadd.f32 %v438_v22, %v359_v35  ;;  %v455_v7 = vpop.permute.xlu1 %454 }
 0x2ec   :  { %v457_v1 = vadd.f32 %v455_v7, %v1024_v49 }
 0x2ee   :  { %v458_v43 = vmul.f32 %v457_v1, %v1214_v44 }
 0x2f0   :  { %v459_v20 = vadd.f32 %v458_v43, %v379_v10  ;;  %v475_v26 = vpop.permute.xlu1 %474 }
 0x2f1   :  { %v477_v8 = vadd.f32 %v475_v26, %v1027_v53 }
 0x2f3   :  { %v478_v0 = vmul.f32 %v477_v8, %v467_v56 }
 0x2f5   :  { %v479_v49 = vadd.f32 %v478_v0, %v399_v9  ;;  %v515_v48 = vpop.permute.xlu1 %514 }
 0x2f6   :  { %v517_v21 = vadd.f32 %v515_v48, %v1030_v63 }
 0x2f8   :  { %v518_v2 = vmul.f32 %v517_v21, %v507_v42 }
 0x2fa   :  { %v519_v58 = vadd.f32 %v518_v2, %v439_v54  ;;  %v535_v25 = vpop.permute.xlu1 %534 }
 0x2fb   :  { %v537_v53 = vadd.f32 %v535_v25, %v1033_v14 }
 0x2fc   :  { %v540_v39 = vadd.f32 %v519_v58, %v499_v41 }
 0x2fd   :  { %v538_v50 = vmul.f32 %v537_v53, %v527_v45 }
 0x2ff   :  { %v539_v51 = vadd.f32 %v538_v50, %v459_v20 }
 0x301   :  { %v541_v27 = vadd.f32 %v539_v51, %v479_v49 }
 0x303   :  { %v542_v30 = vadd.f32 %v541_v27, %v540_v39 }
 0x305   :  { %v548_v63 = vsel %vm543_vm9, %v546_v4, %v542_v30 }
 0x306   :  { %549 = vst [vmem:[#allocation7] sm:$0xff] %v548_v63 }
 0x307   :  { %749 = shalt.err (!%p746_p6)
}
 0x308   :  { %s750_s15 = scalar_lea.hbm %s1212_s3, 128 }
 0x309   :  { %p751_p7 = scmp.ne.s32.totalorder %s1212_s3, %s750_s15  ;;  %p754_p8 = scmp.lt.u32.totalorder %s750_s15, %s1212_s3 }
 0x30b   :  { %p756_p9 = pnand %p754_p8, %p751_p7 }
 0x30d   :  { %759 = shalt.err (!%p756_p9)
}
 0x30e   :  { %559 = dma.vmem_to_hbm [thread:$0]  %s557_s11, 128, %s1212_s3, [#allocation4]  }
 0x30f   :  { %764 = dma.done.wait [#allocation4], 128  }
 0x310   :  { %765 = vsyncadd [#allocation4], 4294967168 }
 0x311   :  { %563 = vsyncpa [#allocation3], 1 }
 0x312   :  { %564 = vsyncpa [#allocation6], 1 }
 0x313   :  { %565 = vsyncpa [#allocation4], 1 }

</bundles_post_ra>
